<compile_context>
chip_gen: v7x
topology: tpu7x:2x2x1
jax: 0.10.0
libtpu: 0.0.40
codegen_flags: <defaults>
</compile_context>

<pallas_src>
import functools

import jax
import jax.numpy as jnp
import numpy as np
from jax import lax
from jax.experimental import pallas as pl
from jax.experimental.pallas import tpu as pltpu


def _round_up(a, b):
    return (a + b - 1) // b * b


def _vmem_tile_bytes(rows, cols, itemsize):
    """Physical VMEM footprint of a (rows, cols) tile: lanes pad to 128, sublanes to 32B."""
    sub = max(1, 32 // itemsize)
    return _round_up(rows, sub) * _round_up(cols, 128) * itemsize


def _device_kind():
    try:
        return jax.devices()[0].device_kind.lower()
    except Exception:
        return ""


def _is_v7x(kind):
    return ("v7" in kind) or ("7x" in kind)


def _default_num_partials(kind):
    # v7x has 2 TensorCores per chip; v5e/v6e have 1 -> a second partial there is just
    # a serial duplicate block of wasted DMA+compute plus a second finalize reduce.
    return 2 if _is_v7x(kind) else 1


def _block_target_bytes(kind):
    # Target HBM bytes of logits per grid step (per buffer).
    if _is_v7x(kind) or ("v6" in kind):
        return 6 << 20          # larger blocks -> 90%+ of HBM roofline on v6e/v7x
    return 2 << 20              # v5e (HBM-bound already) and unknown chips


def _vmem_cap_bytes(kind):
    if _is_v7x(kind):
        return 48 << 20         # v7x: only 64 MiB physical VMEM per TC -> leave headroom
    if ("v6" in kind) or ("v5" in kind):
        return 96 << 20         # 128 MiB physical
    return 32 << 20


def _ldam_kernel(*refs, s, total_samples, block_samples, blocks_per_partial,
                 has_weight, classes_first):
    """One grid step of the streaming LDAM cross-entropy reduction.

    classes_first=False: tiles are (TM, C)  (samples on sublanes, classes on lanes).
    classes_first=True : tiles are (C, TN)  (classes on sublanes, samples on lanes)
                         -- the small-C lane-packed layout.
    """
    if has_weight:
        x_ref, t_ref, m_ref, w_ref, o_ref, loss_acc, w_acc = refs
    else:
        x_ref, t_ref, m_ref, o_ref, loss_acc = refs
        w_ref = None
        w_acc = None

    p = pl.program_id(0)             # partial (parallel / megacore axis)
    i = pl.program_id(1)             # block within this partial (reduction axis)
    ni = pl.num_programs(1)

    cax = 0 if classes_first else 1  # class axis of the tile
    sax = 1 - cax                    # sample axis of the tile

    @pl.when(i == 0)
    def _():
        loss_acc[...] = jnp.zeros_like(loss_acc)
        if has_weight:
            w_acc[...] = jnp.zeros_like(w_acc)

    x = x_ref[...].astype(jnp.float32)                     # logits tile
    tgt = t_ref[...]                                       # targets, broadcast over cax

    cls_ids = lax.broadcasted_iota(jnp.int32, x.shape, cax)
    onehot = cls_ids == tgt

    # LDAM margin: subtract m_list[target] only at the target-class logit, scale by s.
    m_b = m_ref[...].astype(jnp.float32)                   # per-class margin vector
    z = jnp.float32(s) * (x - jnp.where(onehot, m_b, 0.0))

    # Numerically stable per-sample cross-entropy: nll = logsumexp(z) - z[target].
    zmax = jnp.max(z, axis=cax, keepdims=True)
    lse = zmax + jnp.log(jnp.sum(jnp.exp(z - zmax), axis=cax, keepdims=True))
    z_t = jnp.sum(jnp.where(onehot, z, 0.0), axis=cax, keepdims=True)
    nll = lse - z_t                                        # per-sample column/row

    # Per-sample validity (tail samples / clamped duplicate blocks); uses the
    # UNCLAMPED block id so duplicate blocks contribute exactly zero.
    base = (p * blocks_per_partial + i) * block_samples
    samp = base + lax.broadcasted_iota(jnp.int32, nll.shape, sax)
    valid = samp < total_samples

    # Per-sample accumulators only (no full (block, C) tiles).  jnp.where selects (not
    # 0/1 multiplies) so NaN/Inf from uninitialized edge padding cannot poison the sums.
    if has_weight:
        w_b = w_ref[...].astype(jnp.float32)
        w_t = jnp.sum(jnp.where(onehot, w_b, 0.0), axis=cax, keepdims=True)
        loss_acc[...] += jnp.where(valid, w_t * nll, 0.0)
        w_acc[...] += jnp.where(valid, w_t, 0.0)
    else:
        loss_acc[...] += jnp.where(valid, nll, 0.0)

    @pl.when(i == ni - 1)
    def _():
        loss_sum = jnp.sum(loss_acc[...])
        if has_weight:
            denom_p = jnp.sum(w_acc[...])
        else:
            denom_p = jnp.float32(0.0)
        lane = lax.broadcasted_iota(jnp.int32, o_ref.shape, 2)
        o_ref[...] = (jnp.where(lane == 0, loss_sum, 0.0)
                      + jnp.where(lane == 1, denom_p, 0.0))


def ldam_loss(x, target, cls_num_list, *, max_m=0.5, weight=None, s=30,
              block_samples=None, num_partials=None):
    """Pallas TPU LDAM loss.  x: (M, C) logits (f32 or bf16); target: (M,) int class ids."""
    assert s > 0
    x = jnp.asarray(x)
    m_rows, c = x.shape
    itemsize = x.dtype.itemsize                  # dtype-aware: bf16 halves HBM traffic

    cls_num = np.asarray(cls_num_list, np.float64).reshape(-1)
    assert cls_num.shape[0] == c, "cls_num_list must have one entry per class"
    m_list = 1.0 / np.sqrt(np.sqrt(cls_num))
    m_list = m_list * (max_m / np.max(m_list))

    has_weight = weight is not None
    if has_weight:
        w_np = np.asarray(weight, np.float32).reshape(-1)
        assert w_np.shape[0] == c, "weight must have one entry per class"

    kind = _device_kind()
    p_count = (_default_num_partials(kind) if num_partials is None
               else max(1, int(num_partials)))
    tgt_bytes = _block_target_bytes(kind)
    vmem_cap = _vmem_cap_bytes(kind)

    classes_first = c <= 64     # small-C: pack the batch along the 128-wide lane axis

    if classes_first:
        # (C, M) layout: classes on sublanes, samples on lanes -> full lane utilization
        # (otherwise every VPU/EUP op runs at C/128 of peak).  The wrapper transpose
        # costs one extra HBM pass but the kernel was compute-bound at small C.
        x_in = x.T
        t_in = jnp.asarray(target).reshape(1, -1).astype(jnp.int32)
        m_in = jnp.asarray(m_list, jnp.float32).reshape(c, 1)
        w_in = jnp.asarray(w_np).reshape(c, 1) if has_weight else None

        tb = tgt_bytes // max(1, c * itemsize) if block_samples is None else int(block_samples)
        tb = min(max(tb, 128), _round_up(m_rows, 128))
        tb = _round_up(tb, 128)

        def vmem_need(n):
            b = 2 * _vmem_tile_bytes(c, n, itemsize)                       # logits x2
            b += 2 * _vmem_tile_bytes(1, n, 4)                             # targets x2
            b += (2 if has_weight else 1) * _vmem_tile_bytes(1, n, 4)      # accumulators
            b += (2 if has_weight else 1) * 2 * _vmem_tile_bytes(c, 1, 4)  # m / w resident
            b += 2 * _vmem_tile_bytes(1, 128, 4)                           # partial output
            return b

        while tb > 128 and vmem_need(tb) > vmem_cap:
            tb = _round_up(max(128, tb // 2), 128)

        sample_block, target_block = (c, tb), (1, tb)
        class_vec_block, acc_shape = (c, 1), (1, tb)
        sample_grid_dim = 1
    else:
        # General path: (M, C) layout, samples on sublanes, classes on lanes.
        x_in = x
        t_in = jnp.asarray(target).reshape(-1, 1).astype(jnp.int32)
        m_in = jnp.asarray(m_list, jnp.float32).reshape(1, c)
        w_in = jnp.asarray(w_np).reshape(1, c) if has_weight else None

        tb = tgt_bytes // max(1, c * itemsize) if block_samples is None else int(block_samples)
        tb = min(max(tb, 8), _round_up(m_rows, 8))
        tb = _round_up(tb, 8)

        def vmem_need(n):
            b = 2 * _vmem_tile_bytes(n, c, itemsize)                       # logits x2
            b += 2 * _vmem_tile_bytes(n, 1, 4)                             # targets x2 (lane-padded)
            b += (2 if has_weight else 1) * _vmem_tile_bytes(n, 1, 4)      # accumulators
            b += (2 if has_weight else 1) * 2 * _vmem_tile_bytes(1, c, 4)  # m / w resident
            b += 2 * _vmem_tile_bytes(1, 128, 4)                           # partial output
            return b

        while tb > 8 and vmem_need(tb) > vmem_cap:
            tb = _round_up(max(8, tb // 2), 8)

        sample_block, target_block = (tb, c), (tb, 1)
        class_vec_block, acc_shape = (1, c), (tb, 1)
        sample_grid_dim = 0

    num_blocks = pl.cdiv(m_rows, tb)
    p_count = max(1, min(p_count, num_blocks))
    bpp = pl.cdiv(num_blocks, p_count)

    # Clamp the block index so it never points past the array; the clamped duplicate
    # blocks are fully masked inside the kernel (sample index >= total_samples).
    def blk(p, i):
        b = jnp.minimum(p * bpp + i, num_blocks - 1)
        return (0, b) if sample_grid_dim == 1 else (b, 0)

    in_specs = [
        pl.BlockSpec(sample_block, blk),                         # logits tile
        pl.BlockSpec(target_block, blk),                         # targets tile
        pl.BlockSpec(class_vec_block, lambda p, i: (0, 0)),      # m_list (resident)
    ]
    inputs = [x_in, t_in, m_in]
    scratch = [pltpu.VMEM(acc_shape, jnp.float32)]               # per-sample loss acc
    if has_weight:
        in_specs.append(pl.BlockSpec(class_vec_block, lambda p, i: (0, 0)))   # weight
        inputs.append(w_in)
        scratch.append(pltpu.VMEM(acc_shape, jnp.float32))       # per-sample weight acc

    kernel = functools.partial(
        _ldam_kernel, s=float(s), total_samples=m_rows, block_samples=tb,
        blocks_per_partial=bpp, has_weight=has_weight, classes_first=classes_first)

    vmem_limit = int(min(vmem_cap, max(32 << 20, vmem_need(tb) + (8 << 20))))

    partials = pl.pallas_call(
        kernel,
        out_shape=jax.ShapeDtypeStruct((p_count, 1, 128), jnp.float32),
        grid_spec=pltpu.PrefetchScalarGridSpec(
            num_scalar_prefetch=0,
            grid=(p_count, bpp),
            in_specs=in_specs,
            out_specs=pl.BlockSpec((1, 1, 128), lambda p, i: (p, 0, 0)),
            scratch_shapes=scratch,
        ),
        compiler_params=pltpu.CompilerParams(
            dimension_semantics=("parallel", "arbitrary"),
            vmem_limit_bytes=vmem_limit),
    )(*inputs)

    loss_sum = jnp.sum(partials[:, 0, 0])
    if has_weight:
        denom = jnp.sum(partials[:, 0, 1])
    else:
        denom = jnp.float32(m_rows)
    return loss_sum / denom


def _reference_ldam(x, target, cls_num_list, max_m=0.5, weight=None, s=30):
    """Pure-JAX reference matching the PyTorch LDAMLoss forward."""
    cls_num = np.asarray(cls_num_list, np.float64).reshape(-1)
    m_list = 1.0 / np.sqrt(np.sqrt(cls_num))
    m_list = m_list * (max_m / np.max(m_list))
    m_list = jnp.asarray(m_list, jnp.float32)

    x = jnp.asarray(x, jnp.float32)
    t = jnp.asarray(target, jnp.int32).reshape(-1)
    c = x.shape[1]
    onehot = jax.nn.one_hot(t, c, dtype=jnp.bool_)
    batch_m = m_list[t][:, None]
    x_m = jnp.where(onehot, x - batch_m, x)
    logp = jax.nn.log_softmax(s * x_m, axis=-1)
    logpt = jnp.take_along_axis(logp, t[:, None], axis=1)[:, 0]
    if weight is not None:
        w = jnp.asarray(weight, jnp.float32)[t]
        return jnp.sum(-w * logpt) / jnp.sum(w)
    return jnp.mean(-logpt)


if __name__ == "__main__":
    key = jax.random.PRNGKey(0)
    k1, k2, k3, k4, k5, k6 = jax.random.split(key, 6)

    # --- Test 1: small-C lane-packed path, unweighted, default tile sizing ---
    M, C = 256, 16
    cls_num_list = [int(v) for v in (1000.0 / (1.0 + np.arange(C)))]   # long-tail counts
    x = jax.random.normal(k1, (M, C), jnp.float32)
    target = jax.random.randint(k2, (M,), 0, C, jnp.int32)

    out = ldam_loss(x, target, cls_num_list, max_m=0.5, weight=None, s=30)
    out = jax.block_until_ready(out)
    ref = _reference_ldam(x, target, cls_num_list, max_m=0.5, weight=None, s=30)
    np.testing.assert_allclose(np.asarray(out), np.asarray(ref), rtol=1e-4, atol=1e-4)

    # --- Test 2: small-C path, class weights + ragged sample count + multi-block accumulation ---
    M2, C2 = 250, 16
    cls_num_list2 = [int(v) for v in (500.0 / np.sqrt(1.0 + np.arange(C2)))]
    weight2 = np.asarray(1.0 + 0.1 * np.arange(C2), np.float32)
    x2 = jax.random.normal(k3, (M2, C2), jnp.float32)
    t2 = jax.random.randint(k4, (M2,), 0, C2, jnp.int32)

    out2 = ldam_loss(x2, t2, cls_num_list2, max_m=0.5, weight=weight2, s=30,
                     block_samples=64)
    out2 = jax.block_until_ready(out2)
    ref2 = _reference_ldam(x2, t2, cls_num_list2, max_m=0.5, weight=weight2, s=30)
    np.testing.assert_allclose(np.asarray(out2), np.asarray(ref2), rtol=1e-4, atol=1e-4)

    # --- Test 3: general (M, C) row-streaming path (C > 64), weighted, ragged tail ---
    M3, C3 = 200, 160
    cls_num_list3 = [int(v) for v in (800.0 / (1.0 + np.arange(C3)))]
    weight3 = np.asarray(1.0 + 0.01 * np.arange(C3), np.float32)
    x3 = jax.random.normal(k5, (M3, C3), jnp.float32)
    t3 = jax.random.randint(k6, (M3,), 0, C3, jnp.int32)

    out3 = ldam_loss(x3, t3, cls_num_list3, max_m=0.5, weight=weight3, s=30,
                     block_samples=64)
    out3 = jax.block_until_ready(out3)
    ref3 = _reference_ldam(x3, t3, cls_num_list3, max_m=0.5, weight=weight3, s=30)
    np.testing.assert_allclose(np.asarray(out3), np.asarray(ref3), rtol=1e-4, atol=1e-4)

    # --- Test 4: bf16 logits end-to-end (cast to f32 happens inside the kernel) ---
    x4 = x.astype(jnp.bfloat16)
    out4 = ldam_loss(x4, target, cls_num_list, max_m=0.5, weight=None, s=30)
    out4 = jax.block_until_ready(out4)
    ref4 = _reference_ldam(x4.astype(jnp.float32), target, cls_num_list,
                           max_m=0.5, weight=None, s=30)
    np.testing.assert_allclose(np.asarray(out4), np.asarray(ref4), rtol=1e-3, atol=1e-3)

    print("KERNEL_OK")
</pallas_src>

<mosaic_0001>
module attributes {stable_mosaic.version = 11 : i64} {
  func.func @_ldam_kernel(%arg0: i32, %arg1: i32, %arg2: memref<16x256xf32, #tpu.memory_space<vmem>>, %arg3: memref<1x256xi32, #tpu.memory_space<vmem>>, %arg4: memref<16x1xf32, #tpu.memory_space<vmem>>, %arg5: memref<1x1x128xf32, #tpu.memory_space<vmem>>, %arg6: memref<1x256xf32, #tpu.memory_space<vmem>>) attributes {dimension_semantics = [#tpu.dimension_semantics<parallel>, #tpu.dimension_semantics<arbitrary>], iteration_bounds = array<i64: 1, 1>, scalar_prefetch = 0 : i64, scratch_operands = 1 : i64, tpu.core_type = #tpu.core_type<tc>, window_params = [{transform_indices = @transform_0, window_bounds = array<i64: 16, 256>}, {transform_indices = @transform_1, window_bounds = array<i64: 1, 256>}, {pipeline_mode = #tpu.pipeline_mode<synchronous>, transform_indices = @transform_2, window_bounds = array<i64: 16, 1>}, {transform_indices = @transform_3, window_bounds = array<i64: 1, 1, 128>}]} {
    %c0_i32 = arith.constant 0 : i32
    %0 = arith.cmpi eq, %arg1, %c0_i32 : i32
    %1 = arith.extui %0 : i1 to i32
    %c0_i32_0 = arith.constant 0 : i32
    %2 = arith.cmpi ne, %1, %c0_i32_0 : i32
    scf.if %2 {
      %cst_19 = arith.constant 0.000000e+00 : f32
      %46 = vector.broadcast %cst_19 : f32 to vector<1x256xf32>
      %c0_20 = arith.constant 0 : index
      %c0_21 = arith.constant 0 : index
      %47 = vector.load %arg6[%c0_20, %c0_21] : memref<1x256xf32, #tpu.memory_space<vmem>>, vector<1x256xf32>
      tpu.vector_store %arg6[%c0_20, %c0_21], %46 {strides = array<i32>} : memref<1x256xf32, #tpu.memory_space<vmem>>, vector<1x256xf32>,
    } else {
    }
    %c0 = arith.constant 0 : index
    %c0_1 = arith.constant 0 : index
    %3 = vector.load %arg2[%c0, %c0_1] : memref<16x256xf32, #tpu.memory_space<vmem>>, vector<16x256xf32>
    %c0_2 = arith.constant 0 : index
    %c0_3 = arith.constant 0 : index
    %4 = vector.load %arg3[%c0_2, %c0_3] : memref<1x256xi32, #tpu.memory_space<vmem>>, vector<1x256xi32>
    %5 = tpu.iota {dimensions = array<i32: 0>} : vector<16x256xi32>
    %6 = vector.broadcast %4 : vector<1x256xi32> to vector<16x256xi32>
    %7 = arith.cmpi eq, %5, %6 : vector<16x256xi32>
    %c0_4 = arith.constant 0 : index
    %c0_5 = arith.constant 0 : index
    %8 = vector.load %arg4[%c0_4, %c0_5] : memref<16x1xf32, #tpu.memory_space<vmem>>, vector<16x1xf32>
    %cst = arith.constant 0.000000e+00 : f32
    %9 = vector.shape_cast %8 : vector<16x1xf32> to vector<16x1xf32>
    %10 = vector.broadcast %9 : vector<16x1xf32> to vector<16x256xf32>
    %11 = vector.broadcast %cst : f32 to vector<16x256xf32>
    %12 = arith.select %7, %10, %11 : vector<16x256xi1>, vector<16x256xf32>
    %13 = arith.subf %3, %12 : vector<16x256xf32>
    %cst_6 = arith.constant 3.000000e+01 : f32
    %14 = vector.broadcast %cst_6 : f32 to vector<16x256xf32>
    %15 = arith.mulf %14, %13 : vector<16x256xf32>
    %cst_7 = arith.constant dense<0xFF800000> : vector<256xf32>
    %16 = vector.multi_reduction <maximumf>, %15, %cst_7 [0] : vector<16x256xf32> to vector<256xf32>
    %17 = vector.shape_cast %16 : vector<256xf32> to vector<1x256xf32>
    %18 = vector.broadcast %17 : vector<1x256xf32> to vector<16x256xf32>
    %19 = arith.subf %15, %18 : vector<16x256xf32>
    %20 = math.exp %19 : vector<16x256xf32>
    %cst_8 = arith.constant dense<0.000000e+00> : vector<256xf32>
    %21 = vector.multi_reduction <add>, %20, %cst_8 [0] : vector<16x256xf32> to vector<256xf32>
    %22 = vector.shape_cast %21 : vector<256xf32> to vector<1x256xf32>
    %23 = math.log %22 : vector<1x256xf32>
    %24 = arith.addf %17, %23 : vector<1x256xf32>
    %cst_9 = arith.constant 0.000000e+00 : f32
    %25 = vector.broadcast %cst_9 : f32 to vector<16x256xf32>
    %26 = arith.select %7, %15, %25 : vector<16x256xi1>, vector<16x256xf32>
    %cst_10 = arith.constant dense<0.000000e+00> : vector<256xf32>
    %27 = vector.multi_reduction <add>, %26, %cst_10 [0] : vector<16x256xf32> to vector<256xf32>
    %28 = vector.shape_cast %27 : vector<256xf32> to vector<1x256xf32>
    %29 = arith.subf %24, %28 : vector<1x256xf32>
    %c1_i32 = arith.constant 1 : i32
    %30 = arith.muli %arg0, %c1_i32 : i32
    %31 = arith.addi %30, %arg1 : i32
    %c256_i32 = arith.constant 256 : i32
    %32 = arith.muli %31, %c256_i32 : i32
    %33 = tpu.iota {dimensions = array<i32: 1>} : vector<1x256xi32>
    %34 = vector.broadcast %32 : i32 to vector<1x256xi32>
    %35 = arith.addi %34, %33 : vector<1x256xi32>
    %c256_i32_11 = arith.constant 256 : i32
    %36 = vector.broadcast %c256_i32_11 : i32 to vector<1x256xi32>
    %37 = arith.cmpi slt, %35, %36 : vector<1x256xi32>
    %c0_12 = arith.constant 0 : index
    %c0_13 = arith.constant 0 : index
    %38 = vector.load %arg6[%c0_12, %c0_13] : memref<1x256xf32, #tpu.memory_space<vmem>>, vector<1x256xf32>
    %cst_14 = arith.constant 0.000000e+00 : f32
    %39 = vector.broadcast %cst_14 : f32 to vector<1x256xf32>
    %40 = arith.select %37, %29, %39 : vector<1x256xi1>, vector<1x256xf32>
    %41 = arith.addf %38, %40 : vector<1x256xf32>
    %c0_15 = arith.constant 0 : index
    %c0_16 = arith.constant 0 : index
    %42 = vector.load %arg6[%c0_15, %c0_16] : memref<1x256xf32, #tpu.memory_space<vmem>>, vector<1x256xf32>
    tpu.vector_store %arg6[%c0_15, %c0_16], %41 {strides = array<i32>} : memref<1x256xf32, #tpu.memory_space<vmem>>, vector<1x256xf32>,
    %c0_i32_17 = arith.constant 0 : i32
    %43 = arith.cmpi eq, %arg1, %c0_i32_17 : i32
    %44 = arith.extui %43 : i1 to i32
    %c0_i32_18 = arith.constant 0 : i32
    %45 = arith.cmpi ne, %44, %c0_i32_18 : i32
    scf.if %45 {
      %c0_19 = arith.constant 0 : index
      %c0_20 = arith.constant 0 : index
      %46 = vector.load %arg6[%c0_19, %c0_20] : memref<1x256xf32, #tpu.memory_space<vmem>>, vector<1x256xf32>
      %47 = vector.shape_cast %46 : vector<1x256xf32> to vector<1x1x256xf32>
      %cst_21 = arith.constant dense<0.000000e+00> : vector<1xf32>
      %48 = vector.multi_reduction <add>, %47, %cst_21 [1, 2] : vector<1x1x256xf32> to vector<1xf32>
      %49 = vector.shape_cast %48 : vector<1xf32> to vector<1x1x1xf32>
      %50 = vector.extract %49[0, 0, 0] : f32 from vector<1x1x1xf32>
      %51 = tpu.iota {dimensions = array<i32: 2>} : vector<1x1x128xi32>
      %c0_i32_22 = arith.constant 0 : i32
      %52 = vector.broadcast %c0_i32_22 : i32 to vector<1x1x128xi32>
      %53 = arith.cmpi eq, %51, %52 : vector<1x1x128xi32>
      %cst_23 = arith.constant 0.000000e+00 : f32
      %54 = vector.broadcast %50 : f32 to vector<1x1x128xf32>
      %55 = vector.broadcast %cst_23 : f32 to vector<1x1x128xf32>
      %56 = arith.select %53, %54, %55 : vector<1x1x128xi1>, vector<1x1x128xf32>
      %c1_i32_24 = arith.constant 1 : i32
      %57 = vector.broadcast %c1_i32_24 : i32 to vector<1x1x128xi32>
      %58 = arith.cmpi eq, %51, %57 : vector<1x1x128xi32>
      %cst_25 = arith.constant 0.000000e+00 : f32
      %cst_26 = arith.constant 0.000000e+00 : f32
      %59 = vector.broadcast %cst_25 : f32 to vector<1x1x128xf32>
      %60 = vector.broadcast %cst_26 : f32 to vector<1x1x128xf32>
      %61 = arith.select %58, %59, %60 : vector<1x1x128xi1>, vector<1x1x128xf32>
      %62 = arith.addf %56, %61 : vector<1x1x128xf32>
      %c0_27 = arith.constant 0 : index
      %c0_28 = arith.constant 0 : index
      %c0_29 = arith.constant 0 : index
      %63 = vector.load %arg5[%c0_27, %c0_28, %c0_29] : memref<1x1x128xf32, #tpu.memory_space<vmem>>, vector<1x1x128xf32>
      tpu.vector_store %arg5[%c0_27, %c0_28, %c0_29], %62 {strides = array<i32>} : memref<1x1x128xf32, #tpu.memory_space<vmem>>, vector<1x1x128xf32>,
    } else {
    }
    return
  }
  func.func @transform_0(%arg0: i32, %arg1: i32) -> (i32, i32) {
    %c1_i32 = arith.constant 1 : i32
    %0 = arith.muli %arg0, %c1_i32 : i32
    %1 = arith.addi %0, %arg1 : i32
    %c0_i32 = arith.constant 0 : i32
    %2 = arith.minsi %1, %c0_i32 : i32
    %c0_i32_0 = arith.constant 0 : i32
    %c0_i32_1 = arith.constant 0 : i32
    return %c0_i32_0, %2 : i32, i32
  }
  func.func @transform_1(%arg0: i32, %arg1: i32) -> (i32, i32) {
    %c1_i32 = arith.constant 1 : i32
    %0 = arith.muli %arg0, %c1_i32 : i32
    %1 = arith.addi %0, %arg1 : i32
    %c0_i32 = arith.constant 0 : i32
    %2 = arith.minsi %1, %c0_i32 : i32
    %c0_i32_0 = arith.constant 0 : i32
    %c0_i32_1 = arith.constant 0 : i32
    return %c0_i32_0, %2 : i32, i32
  }
  func.func @transform_2(%arg0: i32, %arg1: i32) -> (i32, i32) {
    %c0_i32 = arith.constant 0 : i32
    %c0_i32_0 = arith.constant 0 : i32
    %c0_i32_1 = arith.constant 0 : i32
    return %c0_i32, %c0_i32_0 : i32, i32
  }
  func.func @transform_3(%arg0: i32, %arg1: i32) -> (i32, i32, i32) {
    %c0_i32 = arith.constant 0 : i32
    %c0_i32_0 = arith.constant 0 : i32
    %c0_i32_1 = arith.constant 0 : i32
    return %arg0, %c0_i32, %c0_i32_0 : i32, i32, i32
  }
}

</mosaic_0001>

<bundles_post_ra>
// kernel: tpu_custom_call.1
= control target key start
LH: loop header
LB: loop body
LE: loop exit
PB: predicated region body
PF: predicated region fallthrough
CT: control target
= control target key end

     0   :  { %8 = vsyncpa [#allocation4], 0  ;;  %s446_s0 = inlined_call_operand.hbm [shape: f32[16,256], index: 0, kind: input, shape index: {}]   ;;  %s447_s1 = inlined_call_operand.vmem [shape: s32[1,256], index: 1, kind: input, shape index: {}]   ;;  %s448_s2 = inlined_call_operand.vmem [shape: f32[16,1], index: 2, kind: input, shape index: {}]   ;;  %s449_s3 = inlined_call_operand.hbm [shape: f32[1,1,128], index: 3, kind: output, shape index: {}]  }
   0x1   :  { %9 = vsyncpa [#allocation5], 0  ;;  %s347_s12 = smov [#allocation3]   ;;  %s299_s16 = scalar_lea.hbm %s446_s0, 512 }
   0x2   :  { %s21_s13 = sshll.u32 %s347_s12, 4  ;;  %p300_p0 = scmp.ne.s32.totalorder %s446_s0, %s299_s16  ;;  %s22_s13 = int_to_ptr.vmem [resolvable:$true] %s21_s13 }
   0x3   :  { %p303_p1 = scmp.lt.u32.totalorder %s299_s16, %s446_s0 }
   0x5   :  { %p305_p2 = pnand %p303_p1, %p300_p0 }
   0x7   :  { %308 = shalt.err (!%p305_p2)
}
   0x8   :  { %s309_s21 = scalar_lea.vmem %s22_s13, 512  ;;  %p314_p4 = scmp.lt.s32.totalorder %s22_s13, %s22_s13 }
   0x9   :  { %p310_p3 = scmp.ne.s32.totalorder %s22_s13, %s309_s21  ;;  %p315_p5 = scmp.lt.s32.totalorder %s309_s21, %s309_s21 }
   0xb   :  { %p316_p6 = por %p315_p5, %p314_p4 }
   0xd   :  { %p317_p7 = pnand %p316_p6, %p310_p3 }
   0xf   :  { %320 = shalt.err (!%p317_p7)
}
  0x10   :  { %s348_s22 = smov 256   ;;  %s349_s23 = smov 16  }
  0x11   :  { %27 = dma.hbm_to_vmem [thread:$0]  %s446_s0, 512, %s22_s13, [#allocation4], %s348_s22, %s348_s22, %s349_s23  }
  0x12   :  { %343 = dma.done.wait [#allocation4], 512  }
  0x13   :  { %344 = vsyncadd [#allocation4], 4294966784  ;;  %v72_v0 = vlaneseq  ;;  %v350_v1 = vmov 0   ;;  %v351_v3 = vmov 0.0   ;;  %v97_v4 = vld [vmem:[%s448_s2] sm:$0xff]  ;;  %v98_v5 = vld [vmem:[%s448_s2 + $0x8] sm:$0xff] }
  0x14   :  { %286 = vset.pattern.permute.xlu0 %v350_v1  ;;  %v81_v9 = vld [vmem:[%s447_s1] sm:$0x3]  ;;  %v77_v14 = vld [vmem:[#allocation3] sm:$0xff]  ;;  %v78_v15 = vld [vmem:[#allocation3 + $0x8] sm:$0xff]  ;;  %vm239_vm5 = vcmask 1040384   ;;  %s353_s1 = smov [#allocation6]  }
  0x15   :  { %vm387_vm0 = vcmp.lt.s32.totalorder %v72_v0, 256  ;;  %101 = vperm.xlu0 %286, %v97_v4   ;;  %v400_v6 = vshrl.u32 %v72_v0, 7  ;;  %v79_v18 = vld [vmem:[#allocation3 + $0x10] sm:$0xff]  ;;  %v80_v19 = vld [vmem:[#allocation3 + $0x18] sm:$0xff]  ;;  %s263_s2 = sshll.u32 %s353_s1, 4  ;;  %s264_s2 = int_to_ptr.vmem [resolvable:$true] %s263_s2 }
  0x16   :  { %76 = vst.msk [vmem:[#allocation2] sm:$0x3] %vm387_vm0, %v351_v3  ;;  %s321_s5 = scalar_lea.vmem %s264_s2, 16  ;;  %s325_s6 = scalar_lea.vmem %s264_s2, 32 }
  0x17   :  { %v87_v7 = vsub.s32 0, %v400_v6  ;;  %v91_v8 = vsub.s32 1, %v400_v6  ;;  %v84_v12 = vadd.s32 8, %v400_v6  ;;  %p322_p8 = scmp.ne.s32.totalorder %s264_s2, %s321_s5  ;;  %p326_p9 = scmp.lt.s32.totalorder %s264_s2, %s264_s2 }
  0x18   :  { %p327_p10 = scmp.lt.s32.totalorder %s325_s6, %s321_s5 }
  0x19   :  { %106 = vperm.xlu0 %286, %v98_v5   ;;  %v88_v10 = vrot.slane %v81_v9, %v87_v7  ;;  %v92_v11 = vrot.slane %v81_v9, %v91_v8 }
  0x1a   :  { %p328_p11 = por %p327_p10, %p326_p9 }
  0x1b   :  { %vm93_vm1 = vcmp.eq.s32.totalorder %v400_v6, %v88_v10  ;;  %vm94_vm2 = vcmp.eq.s32.totalorder %v400_v6, %v92_v11  ;;  %vm95_vm3 = vcmp.eq.s32.totalorder %v84_v12, %v88_v10  ;;  %vm96_vm4 = vcmp.eq.s32.totalorder %v84_v12, %v92_v11 }
  0x1c   :  { %p329_p12 = pnand %p328_p11, %p322_p8 }
  0x94   :  { %v102_v13 = vpop.permute.xlu0 %101 }
  0x95   :  { %v109_v16 = vsel %vm93_vm1, %v102_v13, 0.0  ;;  %v110_v17 = vsel %vm94_vm2, %v102_v13, 0.0 }
  0x96   :  { %v113_v20 = vsub.f32 %v77_v14, %v109_v16  ;;  %v114_v21 = vsub.f32 %v78_v15, %v110_v17 }
  0x98   :  { %v107_v22 = vpop.permute.xlu0 %106  ;;  %v117_v27 = vmul.f32 30.0, %v113_v20  ;;  %v118_v28 = vmul.f32 30.0, %v114_v21 }
  0x99   :  { %v111_v23 = vsel %vm95_vm3, %v107_v22, 0.0  ;;  %v112_v24 = vsel %vm96_vm4, %v107_v22, 0.0 }
  0x9a   :  { %v115_v25 = vsub.f32 %v79_v18, %v111_v23  ;;  %v116_v26 = vsub.f32 %v80_v19, %v112_v24  ;;  %v167_v61 = vsel %vm93_vm1, %v117_v27, 0.0  ;;  %v168_v63 = vsel %vm94_vm2, %v118_v28, 0.0 }
  0x9c   :  { %v119_v29 = vmul.f32 30.0, %v115_v25  ;;  %v120_v30 = vmul.f32 30.0, %v116_v26  ;;  %v352_v26 = vmov 1966171168  }
  0x9e   :  { %v121_v31 = vmax.f32 %v117_v27, %v119_v29  ;;  %v128_v32 = vmax.f32 %v118_v28, %v120_v30  ;;  %v169_v58 = vsel %vm95_vm3, %v119_v29, 0.0  ;;  %v170_v60 = vsel %vm96_vm4, %v120_v30, 0.0 }
  0x9f   :  { %v171_v3 = vadd.f32 %v169_v58, %v167_v61  ;;  %v178_v5 = vadd.f32 %v170_v60, %v168_v63 }
  0xa0   :  { %v122_v33 = vrot.slane %v121_v31, 4  ;;  %v129_v34 = vrot.slane %v128_v32, 4 }
  0xa1   :  { %v172_v15 = vrot.slane %v171_v3, 4  ;;  %v179_v17 = vrot.slane %v178_v5, 4 }
  0xa2   :  { %v123_v35 = vmax.f32 %v121_v31, %v122_v33  ;;  %v130_v36 = vmax.f32 %v128_v32, %v129_v34 }
  0xa3   :  { %v173_v20 = vadd.f32 %v172_v15, %v171_v3  ;;  %v180_v21 = vadd.f32 %v179_v17, %v178_v5 }
  0xa4   :  { %v124_v37 = vrot.slane %v123_v35, 2  ;;  %v131_v38 = vrot.slane %v130_v36, 2 }
  0xa5   :  { %v174_v11 = vrot.slane %v173_v20, 2  ;;  %v181_v23 = vrot.slane %v180_v21, 2 }
  0xa6   :  { %v125_v39 = vmax.f32 %v123_v35, %v124_v37  ;;  %v132_v40 = vmax.f32 %v130_v36, %v131_v38 }
  0xa7   :  { %v175_v24 = vadd.f32 %v174_v11, %v173_v20  ;;  %v182_v25 = vadd.f32 %v181_v23, %v180_v21 }
  0xa8   :  { %v126_v41 = vrot.slane %v125_v39, 1  ;;  %v133_v42 = vrot.slane %v132_v40, 1 }
  0xaa   :  { %v127_v43 = vmax.f32 %v125_v39, %v126_v41  ;;  %v134_v44 = vmax.f32 %v132_v40, %v133_v42 }
  0xac   :  { %v135_v45 = vsub.f32 %v117_v27, %v127_v43  ;;  %v136_v46 = vsub.f32 %v118_v28, %v134_v44  ;;  %v137_v47 = vsub.f32 %v119_v29, %v127_v43  ;;  %v138_v48 = vsub.f32 %v120_v30, %v134_v44 }
  0xad   :  { %v204_v27 = vunpack.c.l.s4 %v352_v26  ;;  %v176_v28 = vrot.slane %v175_v24, 1  ;;  %v183_v30 = vrot.slane %v182_v25, 1 }
  0xae   :  { %v139_v49 = vmul.f32 1.442695, %v135_v45  ;;  %v141_v50 = vmul.f32 1.442695, %v136_v46  ;;  %v143_v51 = vmul.f32 1.442695, %v137_v47 }
  0xaf   :  { %v145_v52 = vmul.f32 1.442695, %v138_v48  ;;  %v205_v33 = vunpack.c.0.s8 %v204_v27  ;;  %v177_v36 = vadd.f32 %v176_v28, %v175_v24  ;;  %v184_v38 = vadd.f32 %v183_v30, %v182_v25  ;;  %v197_v46 = vld [vmem:[#allocation2] sm:$0x3] }
  0xb0   :  { %287 = vpow2.f32 %v139_v49 }
  0xb1   :  { %289 = vpow2.f32 %v141_v50  ;;  %v208_v40 = vsub.s32 %v205_v33, %v400_v6 }
  0xb2   :  { %291 = vpow2.f32 %v143_v51 }
  0xb3   :  { %293 = vpow2.f32 %v145_v52 }
  0xba   :  { %v288_v53 = vpop.eup %287 }
  0xbb   :  { %v290_v54 = vpop.eup %289 }
  0xbc   :  { %v292_v55 = vpop.eup %291 }
  0xbd   :  { %v294_v56 = vpop.eup %293  ;;  %v147_v57 = vadd.f32 %v292_v55, %v288_v53 }
  0xbe   :  { %v154_v59 = vadd.f32 %v294_v56, %v290_v54 }
  0xbf   :  { %v148_v62 = vrot.slane %v147_v57, 4 }
  0xc0   :  { %v155_v1 = vrot.slane %v154_v59, 4 }
  0xc1   :  { %v149_v4 = vadd.f32 %v148_v62, %v147_v57 }
  0xc2   :  { %v156_v9 = vadd.f32 %v155_v1, %v154_v59  ;;  %v190_v59 = vand.u32 127, %v72_v0 }
  0xc3   :  { %v150_v13 = vrot.slane %v149_v4, 2 }
  0xc4   :  { %v157_v14 = vrot.slane %v156_v9, 2  ;;  %vm252_vm6 = vcmp.eq.s32.totalorder %v190_v59, 0 }
  0xc5   :  { %v151_v16 = vadd.f32 %v150_v13, %v149_v4 }
  0xc6   :  { %v158_v18 = vadd.f32 %v157_v14, %v156_v9 }
  0xc7   :  { %v152_v12 = vrot.slane %v151_v16, 1 }
  0xc8   :  { %v159_v19 = vrot.slane %v158_v18, 1 }
  0xc9   :  { %v153_v10 = vadd.f32 %v152_v12, %v151_v16 }
  0xca   :  { %v160_v22 = vadd.f32 %v159_v19, %v158_v18 }
  0xcb   :  { %295 = vlog2.f32 %v153_v10 }
  0xcc   :  { %297 = vlog2.f32 %v160_v22 }
  0xd5   :  { %v296_v29 = vpop.eup %295 }
  0xd6   :  { %v298_v31 = vpop.eup %297  ;;  %v162_v32 = vmul.f32 0.6931472, %v296_v29 }
  0xd7   :  { %v164_v34 = vmul.f32 0.6931472, %v298_v31 }
  0xd8   :  { %v165_v35 = vadd.f32 %v162_v32, %v127_v43 }
  0xd9   :  { %v166_v37 = vadd.f32 %v164_v34, %v134_v44 }
  0xda   :  { %v185_v39 = vsub.f32 %v165_v35, %v177_v36 }
  0xdb   :  { %v186_v41 = vsub.f32 %v166_v37, %v184_v38 }
  0xdd   :  { %v202_v42 = vcombine.low %v185_v39, %v186_v41 }
  0xdf   :  { %v209_v45 = vrot.slane %v202_v42, %v208_v40 }
  0xe1   :  { %v216_v47 = vrot.slane %v209_v45, %v208_v40 }
  0xe3   :  { %v218_v48 = vadd.f32 %v216_v47, %v197_v46 }
  0xe5   :  { %223 = vst.msk [vmem:[#allocation2] sm:$0x3] %vm387_vm0, %v218_v48 }
  0xec   :  { %v227_v49 = vld [vmem:[#allocation2] sm:$0x3] }
  0xed   :  { %v232_v43 = vrot.slane %v227_v49, %v87_v7  ;;  %v236_v44 = vrot.slane %v227_v49, %v91_v8 }
  0xef   :  { %v240_v50 = vsel %vm239_vm5, %v232_v43, 0.0  ;;  %v241_v51 = vsel %vm239_vm5, %v236_v44, 0.0 }
  0xf0   :  { %v242_v52 = vadd.f32 %v241_v51, %v240_v50 }
  0xf2   :  { %243 = vadd.xlane.f32.xlu1 %v242_v52 }
 0x17f   :  { %v244_v53 = vpop.xlane.xlu1 %243 }
 0x180   :  { %v245_v54 = vrot.slane %v244_v53, 4 }
 0x182   :  { %v246_v55 = vadd.f32 %v245_v54, %v244_v53 }
 0x184   :  { %v247_v56 = vrot.slane %v246_v55, 2 }
 0x186   :  { %v248_v57 = vadd.f32 %v247_v56, %v246_v55 }
 0x188   :  { %v249_v58 = vrot.slane %v248_v57, 1 }
 0x18a   :  { %v250_v2 = vadd.f32 %v249_v58, %v248_v57 }
 0x18c   :  { %277 = vpush %v250_v2 }
 0x1bd   :  { %s278_s4 = spop %277 }
 0x1be   :  { %v253_v6 = vstv %s278_s4 }
 0x1bf   :  { %v254_v7 = vsel %vm252_vm6, %v253_v6, 0.0 }
 0x1c0   :  { %256 = vst [vmem:[#allocation6] sm:$0x1] %v254_v7 }
 0x1c1   :  { %332 = shalt.err (!%p329_p12)
}
 0x1c2   :  { %s333_s9 = scalar_lea.hbm %s449_s3, 16 }
 0x1c3   :  { %p334_p13 = scmp.ne.s32.totalorder %s449_s3, %s333_s9  ;;  %p337_p0 = scmp.lt.u32.totalorder %s333_s9, %s449_s3 }
 0x1c5   :  { %p339_p1 = pnand %p337_p0, %p334_p13 }
 0x1c7   :  { %342 = shalt.err (!%p339_p1)
}
 0x1c8   :  { %266 = dma.vmem_to_hbm [thread:$0]  %s264_s2, 16, %s449_s3, [#allocation5]  }
 0x1c9   :  { %345 = dma.done.wait [#allocation5], 16  }
 0x1ca   :  { %346 = vsyncadd [#allocation5], 4294967280 }
 0x1cb   :  { %270 = vsyncpa [#allocation4], 1 }
 0x1cc   :  { %271 = vsyncpa [#allocation5], 1 }

</bundles_post_ra>
